<compile_context>
chip_gen: v7x
topology: tpu7x:2x2x1
jax: 0.10.0
libtpu: 0.0.40
codegen_flags: <defaults>
</compile_context>

<pallas_src>
import functools
import math

import jax
import jax.numpy as jnp
from jax.experimental import pallas as pl
from jax.experimental.pallas import tpu as pltpu


# ----------------------------------------------------------------------------- kernel
def _norm_kernel(x_ref, alpha_ref, bias_ref, o_ref, *, eps, d):
    """Row-wise norm over the last (lane) axis of a (block_rows, D) block."""
    x = x_ref[...].astype(jnp.float32)                       # (block_rows, D)

    # One-pass statistics: sum and sum-of-squares along the feature axis.
    s1 = jnp.sum(x, axis=-1, keepdims=True)                  # (block_rows, 1)
    s2 = jnp.sum(x * x, axis=-1, keepdims=True)              # (block_rows, 1)
    mean = s1 * (1.0 / d)
    # PyTorch Tensor.std default is unbiased (N-1 denominator).
    var = (s2 - s1 * mean) * (1.0 / max(d - 1, 1))
    var = jnp.maximum(var, 0.0)                              # guard tiny cancellation error
    std = jnp.sqrt(var)
    inv = pl.reciprocal(std + eps)                           # eps added to std, as in the module

    y = (x - mean) * inv * alpha_ref[...] + bias_ref[...]    # alpha/bias: (1, D) broadcast
    o_ref[...] = y.astype(o_ref.dtype)


# ----------------------------------------------------------------------------- wrapper
def norm_forward(x, alpha, bias, *, eps=1e-6, dim=-1, block_rows=None):
    """Pallas implementation of Norm.forward. x: any shape; d_model = x.shape[dim]."""
    nd = x.ndim
    dim = dim % nd
    needs_swap = dim != nd - 1
    if needs_swap:
        # Mirrors the module's own x.transpose(dim, -1); skipped entirely for dim == -1.
        x = jnp.swapaxes(x, dim, -1)

    D = x.shape[-1]
    if D < 2:
        # TODO(synk): d_model == 1 gives NaN in PyTorch (unbiased std over one element);
        # not supported here either.
        raise ValueError("Norm requires d_model >= 2")
    R = math.prod(x.shape[:-1]) if x.ndim > 1 else 1
    x2 = x.reshape(R, D)                                     # free view for contiguous x

    if block_rows is None:
        if R <= 1024:
            block_rows = R                                   # block == full dim -> always legal
        else:
            br = max(8, (2 * 1024 * 1024) // (D * 4))        # ~2 MiB f32 per block
            block_rows = max(8, (min(R, br) // 8) * 8)       # multiple of 8 sublanes
    grid = (pl.cdiv(R, block_rows),)

    alpha2 = alpha.reshape(1, D).astype(jnp.float32)
    bias2 = bias.reshape(1, D).astype(jnp.float32)

    kernel = functools.partial(_norm_kernel, eps=float(eps), d=int(D))
    y2 = pl.pallas_call(
        kernel,
        out_shape=jax.ShapeDtypeStruct((R, D), x.dtype),
        grid=grid,
        in_specs=[
            pl.BlockSpec((block_rows, D), lambda i: (i, 0)),
            pl.BlockSpec((1, D), lambda i: (0, 0)),
            pl.BlockSpec((1, D), lambda i: (0, 0)),
        ],
        out_specs=pl.BlockSpec((block_rows, D), lambda i: (i, 0)),
        compiler_params=pltpu.CompilerParams(
            dimension_semantics=("parallel",)),
    )(x2, alpha2, bias2)

    y = y2.reshape(x.shape)
    if needs_swap:
        y = jnp.swapaxes(y, dim, -1)
    return y


# ----------------------------------------------------------------------------- pure-JAX reference
def _ref_norm(x, alpha, bias, eps, dim):
    xt = jnp.swapaxes(x, dim, -1)
    m = jnp.mean(xt, axis=-1, keepdims=True)
    s = jnp.std(xt, axis=-1, keepdims=True, ddof=1)
    y = alpha * (xt - m) / (s + eps) + bias
    return jnp.swapaxes(y, dim, -1)


# ----------------------------------------------------------------------------- main
if __name__ == "__main__":
    key = jax.random.PRNGKey(0)
    k1, k2, k3 = jax.random.split(key, 3)

    # Default usage: dim = -1, d_model sits on the lane axis (lane-dense, no relayout).
    B, T, D = 4, 16, 128
    x = jax.random.normal(k1, (B, T, D), dtype=jnp.float32)
    alpha = jnp.ones((D,), jnp.float32)      # module init: nn.Parameter(torch.ones(d_model))
    bias = jnp.zeros((D,), jnp.float32)      # module init: nn.Parameter(torch.zeros(d_model))

    y = norm_forward(x, alpha, bias, eps=1e-6, dim=-1)
    jax.block_until_ready(y)
    y_ref = _ref_norm(x, alpha, bias, 1e-6, -1)
    assert jnp.allclose(y, y_ref, atol=1e-5, rtol=1e-5), float(jnp.max(jnp.abs(y - y_ref)))

    # Non-trivial (post-training-like) parameters and dim != -1 (module's transpose path).
    d_model = T
    alpha2 = 1.0 + 0.1 * jax.random.normal(k2, (d_model,), dtype=jnp.float32)
    bias2 = 0.1 * jax.random.normal(k3, (d_model,), dtype=jnp.float32)
    y2 = norm_forward(x, alpha2, bias2, eps=1e-6, dim=1)
    jax.block_until_ready(y2)
    y2_ref = _ref_norm(x, alpha2, bias2, 1e-6, 1)
    assert jnp.allclose(y2, y2_ref, atol=1e-5, rtol=1e-5), float(jnp.max(jnp.abs(y2 - y2_ref)))

    print("KERNEL_OK")
</pallas_src>

<mosaic_0001>
module attributes {stable_mosaic.version = 11 : i64} {
  func.func @_norm_kernel(%arg0: i32, %arg1: memref<64x128xf32, #tpu.memory_space<vmem>>, %arg2: memref<1x128xf32, #tpu.memory_space<vmem>>, %arg3: memref<1x128xf32, #tpu.memory_space<vmem>>, %arg4: memref<64x128xf32, #tpu.memory_space<vmem>>) attributes {dimension_semantics = [#tpu.dimension_semantics<parallel>], iteration_bounds = array<i64: 1>, scalar_prefetch = 0 : i64, scratch_operands = 0 : i64, tpu.core_type = #tpu.core_type<tc>, window_params = [{transform_indices = @transform_0, window_bounds = array<i64: 64, 128>}, {pipeline_mode = #tpu.pipeline_mode<synchronous>, transform_indices = @transform_1, window_bounds = array<i64: 1, 128>}, {pipeline_mode = #tpu.pipeline_mode<synchronous>, transform_indices = @transform_2, window_bounds = array<i64: 1, 128>}, {transform_indices = @transform_3, window_bounds = array<i64: 64, 128>}]} {
    %c0 = arith.constant 0 : index
    %c0_0 = arith.constant 0 : index
    %0 = vector.load %arg1[%c0, %c0_0] : memref<64x128xf32, #tpu.memory_space<vmem>>, vector<64x128xf32>
    %cst = arith.constant dense<0.000000e+00> : vector<64xf32>
    %1 = vector.multi_reduction <add>, %0, %cst [1] : vector<64x128xf32> to vector<64xf32>
    %2 = vector.shape_cast %1 : vector<64xf32> to vector<64x1xf32>
    %3 = arith.mulf %0, %0 : vector<64x128xf32>
    %cst_1 = arith.constant dense<0.000000e+00> : vector<64xf32>
    %4 = vector.multi_reduction <add>, %3, %cst_1 [1] : vector<64x128xf32> to vector<64xf32>
    %5 = vector.shape_cast %4 : vector<64xf32> to vector<64x1xf32>
    %cst_2 = arith.constant 7.812500e-03 : f32
    %6 = vector.broadcast %cst_2 : f32 to vector<64x1xf32>
    %7 = arith.mulf %2, %6 : vector<64x1xf32>
    %8 = arith.mulf %2, %7 : vector<64x1xf32>
    %9 = arith.subf %5, %8 : vector<64x1xf32>
    %cst_3 = arith.constant 0.00787401571 : f32
    %10 = vector.broadcast %cst_3 : f32 to vector<64x1xf32>
    %11 = arith.mulf %9, %10 : vector<64x1xf32>
    %cst_4 = arith.constant 0.000000e+00 : f32
    %12 = vector.broadcast %cst_4 : f32 to vector<64x1xf32>
    %13 = arith.maximumf %11, %12 : vector<64x1xf32>
    %14 = math.sqrt %13 : vector<64x1xf32>
    %cst_5 = arith.constant 9.99999997E-7 : f32
    %15 = vector.broadcast %cst_5 : f32 to vector<64x1xf32>
    %16 = arith.addf %14, %15 : vector<64x1xf32>
    %17 = tpu.reciprocal %16 : vector<64x1xf32> -> vector<64x1xf32>
    %18 = vector.broadcast %7 : vector<64x1xf32> to vector<64x128xf32>
    %19 = arith.subf %0, %18 : vector<64x128xf32>
    %20 = vector.broadcast %17 : vector<64x1xf32> to vector<64x128xf32>
    %21 = arith.mulf %19, %20 : vector<64x128xf32>
    %c0_6 = arith.constant 0 : index
    %c0_7 = arith.constant 0 : index
    %22 = vector.load %arg2[%c0_6, %c0_7] : memref<1x128xf32, #tpu.memory_space<vmem>>, vector<1x128xf32>
    %23 = vector.broadcast %22 : vector<1x128xf32> to vector<64x128xf32>
    %24 = arith.mulf %21, %23 : vector<64x128xf32>
    %c0_8 = arith.constant 0 : index
    %c0_9 = arith.constant 0 : index
    %25 = vector.load %arg3[%c0_8, %c0_9] : memref<1x128xf32, #tpu.memory_space<vmem>>, vector<1x128xf32>
    %26 = vector.broadcast %25 : vector<1x128xf32> to vector<64x128xf32>
    %27 = arith.addf %24, %26 : vector<64x128xf32>
    %c0_10 = arith.constant 0 : index
    %c0_11 = arith.constant 0 : index
    %28 = vector.load %arg4[%c0_10, %c0_11] : memref<64x128xf32, #tpu.memory_space<vmem>>, vector<64x128xf32>
    tpu.vector_store %arg4[%c0_10, %c0_11], %27 {strides = array<i32>} : memref<64x128xf32, #tpu.memory_space<vmem>>, vector<64x128xf32>,
    return
  }
  func.func @transform_0(%arg0: i32) -> (i32, i32) {
    %c0_i32 = arith.constant 0 : i32
    %c0_i32_0 = arith.constant 0 : i32
    return %arg0, %c0_i32 : i32, i32
  }
  func.func @transform_1(%arg0: i32) -> (i32, i32) {
    %c0_i32 = arith.constant 0 : i32
    %c0_i32_0 = arith.constant 0 : i32
    %c0_i32_1 = arith.constant 0 : i32
    return %c0_i32, %c0_i32_0 : i32, i32
  }
  func.func @transform_2(%arg0: i32) -> (i32, i32) {
    %c0_i32 = arith.constant 0 : i32
    %c0_i32_0 = arith.constant 0 : i32
    %c0_i32_1 = arith.constant 0 : i32
    return %c0_i32, %c0_i32_0 : i32, i32
  }
  func.func @transform_3(%arg0: i32) -> (i32, i32) {
    %c0_i32 = arith.constant 0 : i32
    %c0_i32_0 = arith.constant 0 : i32
    return %arg0, %c0_i32 : i32, i32
  }
}

</mosaic_0001>

<bundles_post_ra>
// kernel: tpu_custom_call.1
= control target key start
LH: loop header
LB: loop body
LE: loop exit
PB: predicated region body
PF: predicated region fallthrough
CT: control target
= control target key end

     0   :  { %8 = vsyncpa [#allocation3], 0  ;;  %s502_s0 = inlined_call_operand.hbm [shape: f32[64,128], index: 0, kind: input, shape index: {}]   ;;  %s503_s1 = inlined_call_operand.vmem [shape: f32[1,128], index: 1, kind: input, shape index: {}]   ;;  %s504_s2 = inlined_call_operand.vmem [shape: f32[1,128], index: 2, kind: input, shape index: {}]   ;;  %s505_s3 = inlined_call_operand.hbm [shape: f32[64,128], index: 3, kind: output, shape index: {}]  }
   0x1   :  { %9 = vsyncpa [#allocation4], 0  ;;  %s346_s12 = smov [#allocation2]   ;;  %s298_s16 = scalar_lea.hbm %s502_s0, 1024 }
   0x2   :  { %s15_s13 = sshll.u32 %s346_s12, 4  ;;  %p299_p0 = scmp.ne.s32.totalorder %s502_s0, %s298_s16  ;;  %s16_s13 = int_to_ptr.vmem [resolvable:$true] %s15_s13 }
   0x3   :  { %p302_p1 = scmp.lt.u32.totalorder %s298_s16, %s502_s0 }
   0x5   :  { %p304_p2 = pnand %p302_p1, %p299_p0 }
   0x7   :  { %307 = shalt.err (!%p304_p2)
}
   0x8   :  { %s308_s21 = scalar_lea.vmem %s16_s13, 1024  ;;  %p313_p4 = scmp.lt.s32.totalorder %s16_s13, %s16_s13 }
   0x9   :  { %p309_p3 = scmp.ne.s32.totalorder %s16_s13, %s308_s21  ;;  %p314_p5 = scmp.lt.s32.totalorder %s308_s21, %s308_s21 }
   0xb   :  { %p315_p6 = por %p314_p5, %p313_p4 }
   0xd   :  { %p316_p7 = pnand %p315_p6, %p309_p3 }
   0xf   :  { %319 = shalt.err (!%p316_p7)
}
  0x10   :  { %s347_s22 = smov 128   ;;  %s348_s23 = smov 8  }
  0x11   :  { %21 = dma.hbm_to_vmem [thread:$0]  %s502_s0, 1024, %s16_s13, [#allocation3], %s347_s22, %s347_s22, %s348_s23  }
  0x12   :  { %342 = dma.done.wait [#allocation3], 1024  }
  0x13   :  { %343 = vsyncadd [#allocation3], 4294966272  ;;  %v385_v0 = vld [vmem:[#allocation2 + $0x10] sm:$0xff]  ;;  %v387_v1 = vld [vmem:[#allocation2] sm:$0xff] }
  0x14   :  { %41 = vadd.xlane.f32.xlu1 %v385_v0  ;;  %37 = vadd.xlane.f32.xlu0 %v387_v1  ;;  %v391_v2 = vld [vmem:[#allocation2 + $0x18] sm:$0xff]  ;;  %v393_v3 = vld [vmem:[#allocation2 + $0x8] sm:$0xff]  ;;  %v399_v5 = vld [vmem:[#allocation2 + $0x20] sm:$0xff]  ;;  %v53_v9 = vmul.f32 %v387_v1, %v387_v1  ;;  %v55_v11 = vmul.f32 %v385_v0, %v385_v0 }
  0x15   :  { %v397_v4 = vld [vmem:[#allocation2 + $0x28] sm:$0xff]  ;;  %v403_v6 = vld [vmem:[#allocation2 + $0x38] sm:$0xff]  ;;  %v405_v7 = vld [vmem:[#allocation2 + $0x30] sm:$0xff]  ;;  %v54_v8 = vmul.f32 %v393_v3, %v393_v3  ;;  %v56_v10 = vmul.f32 %v391_v2, %v391_v2  ;;  %v57_v13 = vmul.f32 %v399_v5, %v399_v5 }
  0x16   :  { %v58_v12 = vmul.f32 %v397_v4, %v397_v4  ;;  %v60_v14 = vmul.f32 %v403_v6, %v403_v6  ;;  %v59_v15 = vmul.f32 %v405_v7, %v405_v7 }
  0x18   :  { %43 = vadd.xlane.f32.xlu1 %v391_v2  ;;  %39 = vadd.xlane.f32.xlu0 %v393_v3 }
  0x1c   :  { %47 = vadd.xlane.f32.xlu1 %v397_v4  ;;  %45 = vadd.xlane.f32.xlu0 %v399_v5 }
  0x20   :  { %51 = vadd.xlane.f32.xlu1 %v403_v6  ;;  %49 = vadd.xlane.f32.xlu0 %v405_v7 }
  0x24   :  { %63 = vadd.xlane.f32.xlu1 %v54_v8  ;;  %61 = vadd.xlane.f32.xlu0 %v53_v9 }
  0x28   :  { %67 = vadd.xlane.f32.xlu1 %v56_v10  ;;  %65 = vadd.xlane.f32.xlu0 %v55_v11 }
  0x2c   :  { %71 = vadd.xlane.f32.xlu1 %v58_v12  ;;  %69 = vadd.xlane.f32.xlu0 %v57_v13 }
  0x30   :  { %75 = vadd.xlane.f32.xlu1 %v60_v14  ;;  %73 = vadd.xlane.f32.xlu0 %v59_v15 }
  0xa1   :  { %v42_v16 = vpop.xlane.xlu1 %41  ;;  %v38_v17 = vpop.xlane.xlu0 %37 }
  0xa2   :  { %v425_v22 = vmul.f32 0.0078125, %v38_v17  ;;  %v429_v26 = vmul.f32 0.0078125, %v42_v16 }
  0xa4   :  { %v85_v28 = vmul.f32 %v425_v22, %v38_v17  ;;  %v87_v34 = vmul.f32 %v429_v26, %v42_v16 }
  0xa5   :  { %v44_v18 = vpop.xlane.xlu1 %43  ;;  %v40_v19 = vpop.xlane.xlu0 %39 }
  0xa6   :  { %v427_v23 = vmul.f32 0.0078125, %v40_v19  ;;  %v431_v27 = vmul.f32 0.0078125, %v44_v18 }
  0xa8   :  { %v86_v29 = vmul.f32 %v427_v23, %v40_v19  ;;  %v88_v35 = vmul.f32 %v431_v27, %v44_v18 }
  0xa9   :  { %v48_v20 = vpop.xlane.xlu1 %47  ;;  %v46_v21 = vpop.xlane.xlu0 %45 }
  0xaa   :  { %v437_v36 = vmul.f32 0.0078125, %v48_v20  ;;  %v439_v37 = vmul.f32 0.0078125, %v46_v21 }
  0xac   :  { %v90_v46 = vmul.f32 %v437_v36, %v48_v20  ;;  %v89_v47 = vmul.f32 %v439_v37, %v46_v21 }
  0xad   :  { %v52_v24 = vpop.xlane.xlu1 %51  ;;  %v50_v25 = vpop.xlane.xlu0 %49 }
  0xae   :  { %v443_v48 = vmul.f32 0.0078125, %v52_v24  ;;  %v445_v49 = vmul.f32 0.0078125, %v50_v25 }
  0xb0   :  { %v92_v62 = vmul.f32 %v443_v48, %v52_v24  ;;  %v91_v63 = vmul.f32 %v445_v49, %v50_v25 }
  0xb1   :  { %v64_v30 = vpop.xlane.xlu1 %63  ;;  %v62_v31 = vpop.xlane.xlu0 %61 }
  0xb2   :  { %v94_v32 = vsub.f32 %v64_v30, %v86_v29  ;;  %v93_v33 = vsub.f32 %v62_v31, %v85_v28 }
  0xb4   :  { %v102_v38 = vmul.f32 0.007874016, %v94_v32  ;;  %v101_v39 = vmul.f32 0.007874016, %v93_v33 }
  0xb5   :  { %v68_v40 = vpop.xlane.xlu1 %67  ;;  %v66_v41 = vpop.xlane.xlu0 %65 }
  0xb6   :  { %v110_v42 = vmax.f32 %v102_v38, 0.0  ;;  %v109_v43 = vmax.f32 %v101_v39, 0.0  ;;  %v96_v44 = vsub.f32 %v68_v40, %v88_v35  ;;  %v95_v45 = vsub.f32 %v66_v41, %v87_v34 }
  0xb8   :  { %266 = vrsqrt.f32 %v110_v42  ;;  %v104_v52 = vmul.f32 0.007874016, %v96_v44  ;;  %v103_v53 = vmul.f32 0.007874016, %v95_v45  ;;  %vm126_vm0 = vcmp.eq.f32.partialorder %v110_v42, inf }
  0xb9   :  { %268 = vrsqrt.f32 %v109_v43  ;;  %v72_v50 = vpop.xlane.xlu1 %71  ;;  %v70_v51 = vpop.xlane.xlu0 %69  ;;  %v129_v15 = vand.u32 2147483648, %v110_v42  ;;  %vm128_vm1 = vcmp.eq.f32.partialorder %v110_v42, 0.0  ;;  %vm119_vm2 = vcmp.eq.f32.partialorder %v109_v43, inf }
  0xba   :  { %v98_v54 = vsub.f32 %v72_v50, %v90_v46  ;;  %v97_v55 = vsub.f32 %v70_v51, %v89_v47  ;;  %v112_v56 = vmax.f32 %v104_v52, 0.0  ;;  %v111_v57 = vmax.f32 %v103_v53, 0.0 }
  0xbb   :  { %v122_v20 = vand.u32 2147483648, %v109_v43  ;;  %vm121_vm3 = vcmp.eq.f32.partialorder %v109_v43, 0.0 }
  0xbc   :  { %v106_v58 = vmul.f32 0.007874016, %v98_v54  ;;  %v105_v59 = vmul.f32 0.007874016, %v97_v55  ;;  %270 = vrsqrt.f32 %v112_v56  ;;  %vm140_vm4 = vcmp.eq.f32.partialorder %v112_v56, inf }
  0xbd   :  { %v76_v60 = vpop.xlane.xlu1 %75  ;;  %v74_v61 = vpop.xlane.xlu0 %73  ;;  %272 = vrsqrt.f32 %v111_v57  ;;  %vm142_vm5 = vcmp.eq.f32.partialorder %v112_v56, 0.0  ;;  %v143_v35 = vand.u32 2147483648, %v112_v56  ;;  %vm133_vm6 = vcmp.eq.f32.partialorder %v111_v57, inf }
  0xbe   :  { %v114_v8 = vmax.f32 %v106_v58, 0.0  ;;  %v449_v9 = vmax.f32 %v105_v59, 0.0  ;;  %v100_v10 = vsub.f32 %v76_v60, %v92_v62  ;;  %v99_v11 = vsub.f32 %v74_v61, %v91_v63 }
  0xbf   :  { %v136_v40 = vand.u32 2147483648, %v111_v57  ;;  %vm135_vm7 = vcmp.eq.f32.partialorder %v111_v57, 0.0  ;;  %v190_v60 = vsub.f32 %v393_v3, %v427_v23  ;;  %v189_v63 = vsub.f32 %v387_v1, %v425_v22  ;;  %v261_v23 = vld [vmem:[%s504_s2] ss:$0 sm:$0xff] }
  0xc0   :  { %274 = vrsqrt.f32 %v114_v8  ;;  %v108_v17 = vmul.f32 0.007874016, %v100_v10  ;;  %v107_v18 = vmul.f32 0.007874016, %v99_v11  ;;  %vm154_vm8 = vcmp.eq.f32.partialorder %v114_v8, inf }
  0xc1   :  { %276 = vrsqrt.f32 %v449_v9  ;;  %vm156_vm9 = vcmp.eq.f32.partialorder %v114_v8, 0.0  ;;  %v157_v51 = vand.u32 2147483648, %v114_v8  ;;  %vm147_vm10 = vcmp.eq.f32.partialorder %v449_v9, inf  ;;  %v260_v10 = vld [vmem:[%s503_s1] ss:$0 sm:$0xff]  ;;  %s349_s1 = smov [#allocation5]  }
  0xc2   :  { %v267_v12 = vpop.eup %266  ;;  %v116_v25 = vmax.f32 %v108_v17, 0.0  ;;  %v452_v30 = vmax.f32 %v107_v18, 0.0  ;;  %v150_v54 = vand.u32 2147483648, %v449_v9  ;;  %vm149_vm11 = vcmp.eq.f32.partialorder %v449_v9, 0.0  ;;  %s248_s2 = sshll.u32 %s349_s1, 4  ;;  %s249_s2 = int_to_ptr.vmem [resolvable:$true] %s248_s2 }
  0xc3   :  { %v269_v13 = vpop.eup %268  ;;  %v125_v14 = vmul.f32 %v267_v12, %v110_v42  ;;  %s320_s29 = scalar_lea.vmem %s249_s2, 1024  ;;  %p325_p9 = scmp.lt.s32.totalorder %s249_s2, %s249_s2 }
  0xc4   :  { %v118_v16 = vmul.f32 %v269_v13, %v109_v43  ;;  %278 = vrsqrt.f32 %v116_v25  ;;  %vm168_vm12 = vcmp.eq.f32.partialorder %v116_v25, inf  ;;  %vm170_vm13 = vcmp.eq.f32.partialorder %v116_v25, 0.0  ;;  %p321_p8 = scmp.ne.s32.totalorder %s249_s2, %s320_s29  ;;  %p326_p10 = scmp.lt.s32.totalorder %s320_s29, %s320_s29 }
  0xc5   :  { %v127_v19 = vsel %vm126_vm0, %v110_v42, %v125_v14  ;;  %vm161_vm14 = vcmp.eq.f32.partialorder %v452_v30, inf  ;;  %v164_v17 = vand.u32 2147483648, %v452_v30  ;;  %vm163_vm15 = vcmp.eq.f32.partialorder %v452_v30, 0.0 }
  0xc6   :  { %v130_v21 = vsel %vm128_vm1, %v129_v15, %v127_v19  ;;  %v120_v24 = vsel %vm119_vm2, %v109_v43, %v118_v16  ;;  %v271_v31 = vpop.eup %270  ;;  %v192_v19 = vsub.f32 %v391_v2, %v431_v27  ;;  %v194_v2 = vsub.f32 %v397_v4, %v437_v36  ;;  %p327_p11 = por %p326_p10, %p325_p9 }
  0xc7   :  { %v174_v28 = vadd.f32 1e-06, %v130_v21  ;;  %v123_v29 = vsel %vm121_vm3, %v122_v20, %v120_v24  ;;  %v273_v33 = vpop.eup %272  ;;  %v139_v34 = vmul.f32 %v271_v31, %v112_v56 }
  0xc8   :  { %v173_v32 = vadd.f32 1e-06, %v123_v29  ;;  %v132_v38 = vmul.f32 %v273_v33, %v111_v57  ;;  %p328_p12 = pnand %p327_p11, %p321_p8 }
  0xc9   :  { %280 = vrcp.f32 %v174_v28  ;;  %v141_v39 = vsel %vm140_vm4, %v112_v56, %v139_v34 }
  0xca   :  { %282 = vrcp.f32 %v173_v32  ;;  %v275_v41 = vpop.eup %274  ;;  %v144_v42 = vsel %vm142_vm5, %v143_v35, %v141_v39  ;;  %v134_v43 = vsel %vm133_vm6, %v111_v57, %v132_v38  ;;  %v193_v35 = vsub.f32 %v399_v5, %v439_v37 }
  0xcb   :  { %284 = vrsqrt.f32 %v452_v30  ;;  %v277_v44 = vpop.eup %276  ;;  %v176_v45 = vadd.f32 1e-06, %v144_v42  ;;  %v137_v46 = vsel %vm135_vm7, %v136_v40, %v134_v43  ;;  %v153_v47 = vmul.f32 %v275_v41, %v114_v8 }
  0xcc   :  { %v175_v50 = vadd.f32 1e-06, %v137_v46  ;;  %v146_v52 = vmul.f32 %v277_v44, %v449_v9  ;;  %v196_v44 = vsub.f32 %v403_v6, %v443_v48  ;;  %v195_v5 = vsub.f32 %v405_v7, %v445_v49 }
  0xcd   :  { %286 = vrcp.f32 %v176_v45  ;;  %v155_v53 = vsel %vm154_vm8, %v114_v8, %v153_v47 }
  0xce   :  { %288 = vrcp.f32 %v175_v50  ;;  %v158_v55 = vsel %vm156_vm9, %v157_v51, %v155_v53  ;;  %v148_v56 = vsel %vm147_vm10, %v449_v9, %v146_v52  ;;  %v279_v59 = vpop.eup %278  ;;  %v171_v9 = vand.u32 2147483648, %v116_v25 }
  0xcf   :  { %v178_v57 = vadd.f32 1e-06, %v158_v55  ;;  %v151_v58 = vsel %vm149_vm11, %v150_v54, %v148_v56  ;;  %v167_v8 = vmul.f32 %v279_v59, %v116_v25 }
  0xd0   :  { %v177_v61 = vadd.f32 1e-06, %v151_v58 }
  0xd1   :  { %290 = vrcp.f32 %v178_v57  ;;  %v169_v14 = vsel %vm168_vm12, %v116_v25, %v167_v8  ;;  %v191_v25 = vsub.f32 %v385_v0, %v429_v26 }
  0xd2   :  { %292 = vrcp.f32 %v177_v61  ;;  %v172_v1 = vsel %vm170_vm13, %v171_v9, %v169_v14 }
  0xd3   :  { %v281_v62 = vpop.eup %280  ;;  %v180_v16 = vadd.f32 1e-06, %v172_v1 }
  0xd4   :  { %v283_v11 = vpop.eup %282  ;;  %v198_v12 = vmul.f32 %v281_v62, %v190_v60 }
  0xd5   :  { %v285_v13 = vpop.eup %284  ;;  %v197_v3 = vmul.f32 %v283_v11, %v189_v63  ;;  %294 = vrcp.f32 %v180_v16 }
  0xd6   :  { %v160_v22 = vmul.f32 %v285_v13, %v452_v30  ;;  %v213_v15 = vmul.f32 %v260_v10, %v198_v12 }
  0xd7   :  { %v212_v18 = vmul.f32 %v260_v10, %v197_v3  ;;  %v287_v24 = vpop.eup %286 }
  0xd8   :  { %v162_v20 = vsel %vm161_vm14, %v452_v30, %v160_v22  ;;  %v228_v21 = vadd.f32 %v261_v23, %v213_v15  ;;  %v289_v31 = vpop.eup %288  ;;  %v200_v33 = vmul.f32 %v287_v24, %v192_v19 }
  0xd9   :  { %v165_v28 = vsel %vm163_vm15, %v164_v17, %v162_v20  ;;  %v227_v29 = vadd.f32 %v261_v23, %v212_v18  ;;  %v199_v34 = vmul.f32 %v289_v31, %v191_v25 }
  0xda   :  { %v179_v32 = vadd.f32 1e-06, %v165_v28  ;;  %236 = vst [vmem:[#allocation5 + $0x8] sm:$0xff] %v228_v21  ;;  %v215_v27 = vmul.f32 %v260_v10, %v200_v33 }
  0xdb   :  { %235 = vst [vmem:[#allocation5] sm:$0xff] %v227_v29  ;;  %v291_v30 = vpop.eup %290  ;;  %v214_v38 = vmul.f32 %v260_v10, %v199_v34 }
  0xdc   :  { %296 = vrcp.f32 %v179_v32  ;;  %v293_v0 = vpop.eup %292  ;;  %v202_v26 = vmul.f32 %v291_v30, %v194_v2  ;;  %v230_v39 = vadd.f32 %v261_v23, %v215_v27 }
  0xdd   :  { %v201_v40 = vmul.f32 %v293_v0, %v193_v35  ;;  %v229_v41 = vadd.f32 %v261_v23, %v214_v38 }
  0xde   :  { %v217_v42 = vmul.f32 %v260_v10, %v202_v26  ;;  %238 = vst [vmem:[#allocation5 + $0x18] sm:$0xff] %v230_v39 }
  0xdf   :  { %v216_v43 = vmul.f32 %v260_v10, %v201_v40  ;;  %237 = vst [vmem:[#allocation5 + $0x10] sm:$0xff] %v229_v41  ;;  %v295_v36 = vpop.eup %294 }
  0xe0   :  { %v232_v4 = vadd.f32 %v261_v23, %v217_v42  ;;  %v204_v46 = vmul.f32 %v295_v36, %v196_v44 }
  0xe1   :  { %v231_v45 = vadd.f32 %v261_v23, %v216_v43 }
  0xe2   :  { %240 = vst [vmem:[#allocation5 + $0x28] sm:$0xff] %v232_v4  ;;  %v219_v47 = vmul.f32 %v260_v10, %v204_v46 }
  0xe3   :  { %239 = vst [vmem:[#allocation5 + $0x20] sm:$0xff] %v231_v45 }
  0xe4   :  { %v234_v51 = vadd.f32 %v261_v23, %v219_v47 }
  0xe6   :  { %v297_v37 = vpop.eup %296  ;;  %242 = vst [vmem:[#allocation5 + $0x38] sm:$0xff] %v234_v51 }
  0xe7   :  { %v203_v50 = vmul.f32 %v297_v37, %v195_v5 }
  0xe9   :  { %v218_v52 = vmul.f32 %v260_v10, %v203_v50 }
  0xeb   :  { %v233_v53 = vadd.f32 %v261_v23, %v218_v52 }
  0xed   :  { %241 = vst [vmem:[#allocation5 + $0x30] sm:$0xff] %v233_v53 }
  0xee   :  { %331 = shalt.err (!%p328_p12)
}
  0xef   :  { %s332_s5 = scalar_lea.hbm %s505_s3, 1024 }
  0xf0   :  { %p333_p13 = scmp.ne.s32.totalorder %s505_s3, %s332_s5  ;;  %p336_p0 = scmp.lt.u32.totalorder %s332_s5, %s505_s3 }
  0xf2   :  { %p338_p1 = pnand %p336_p0, %p333_p13 }
  0xf4   :  { %341 = shalt.err (!%p338_p1)
}
  0xf5   :  { %254 = dma.vmem_to_hbm [thread:$0]  %s249_s2, 1024, %s505_s3, [#allocation4], %s347_s22, %s347_s22, %s348_s23  }
  0xf6   :  { %344 = dma.done.wait [#allocation4], 1024  }
  0xf7   :  { %345 = vsyncadd [#allocation4], 4294966272 }
  0xf8   :  { %258 = vsyncpa [#allocation3], 1 }
  0xf9   :  { %259 = vsyncpa [#allocation4], 1 }

</bundles_post_ra>
